<compile_context>
chip_gen: v7x
topology: tpu7x:2x2x1
jax: 0.10.0
libtpu: 0.0.40
codegen_flags: <defaults>
</compile_context>

<pallas_src>
import jax
import jax.numpy as jnp
from jax import lax
from jax.experimental import pallas as pl
from jax.experimental.pallas import tpu as pltpu


_VMEM_LIMIT = 48 * 1024 * 1024  # above 16/32 MiB defaults, below v7x 64 MiB physical


def _round_up(x, m):
    return ((x + m - 1) // m) * m


# ------------------------------------------------------------------ #
# Tiled linear:  y = x @ w.T + b     (w in PyTorch (OUT, IN) layout)
# ------------------------------------------------------------------ #
def _linear_kernel(x_ref, w_ref, b_ref, o_ref, acc_ref):
    # x: (tm, tk) bf16, w: (tn, tk) bf16, b: (1, tn) f32, acc: (tm, tn) f32
    k = pl.program_id(2)

    @pl.when(k == 0)
    def _():
        acc_ref[...] = jnp.zeros_like(acc_ref)

    # Contract the last axis of both operands: x @ w.T without an XLU transpose.
    acc_ref[...] += lax.dot_general(
        x_ref[...], w_ref[...],
        dimension_numbers=(((1,), (1,)), ((), ())),
        preferred_element_type=jnp.float32)

    @pl.when(k == pl.num_programs(2) - 1)
    def _():
        o_ref[...] = (acc_ref[...] + b_ref[...]).astype(o_ref.dtype)


def linear(x2d, w, b, *, tm=512, tn=512, tk=512):
    """y = x2d @ w.T + b   (x2d: (M, IN), w: (OUT, IN), b: (OUT,)) -> f32 (M, OUT)."""
    M, IN = x2d.shape
    OUT = w.shape[0]

    tm = min(tm, _round_up(M, 8))
    tn = min(tn, _round_up(OUT, 128))
    tk = min(tk, _round_up(IN, 128))
    Mp, Np, Kp = _round_up(M, tm), _round_up(OUT, tn), _round_up(IN, tk)

    # bf16 MXU operands (halves HBM/VMEM traffic); zero-pad to tile multiples
    # (zero padding on the K axis is numerically exact for the matmul).
    xp = jnp.pad(x2d.astype(jnp.bfloat16), ((0, Mp - M), (0, Kp - IN)))
    wp = jnp.pad(w.astype(jnp.bfloat16), ((0, Np - OUT), (0, Kp - IN)))
    bp = jnp.pad(b.astype(jnp.float32), (0, Np - OUT)).reshape(1, Np)

    grid = (Mp // tm, Np // tn, Kp // tk)
    cost = pl.CostEstimate(
        flops=2 * Mp * Np * Kp,
        transcendentals=0,
        bytes_accessed=2 * (Mp * Kp + Np * Kp) + 4 * (Mp * Np + Np))

    out = pl.pallas_call(
        _linear_kernel,
        out_shape=jax.ShapeDtypeStruct((Mp, Np), jnp.float32),
        grid_spec=pltpu.PrefetchScalarGridSpec(
            num_scalar_prefetch=0,
            grid=grid,
            in_specs=[
                pl.BlockSpec((tm, tk), lambda i, j, k: (i, k)),
                pl.BlockSpec((tn, tk), lambda i, j, k: (j, k)),
                pl.BlockSpec((1, tn), lambda i, j, k: (0, j)),
            ],
            out_specs=pl.BlockSpec((tm, tn), lambda i, j, k: (i, j)),
            scratch_shapes=[pltpu.VMEM((tm, tn), jnp.float32)],
        ),
        compiler_params=pltpu.CompilerParams(
            dimension_semantics=("parallel", "parallel", "arbitrary"),
            vmem_limit_bytes=_VMEM_LIMIT),
        cost_estimate=cost,
    )(xp, wp, bp)
    return out[:M, :OUT]


# ------------------------------------------------------------------ #
# Attention (per head, query-tiled)
# ------------------------------------------------------------------ #
def _attention_kernel(q_ref, k_ref, v_ref, o_ref, w_ref):
    # q: (1, tq, D) bf16, pre-scaled by 1/sqrt(D); k, v: (1, N, D) bf16
    q = q_ref[0]
    k = k_ref[0]
    v = v_ref[0]

    # scores = q @ k^T (contract last dims of both -> no explicit transpose)
    scores = lax.dot_general(
        q, k, dimension_numbers=(((1,), (1,)), ((), ())),
        preferred_element_type=jnp.float32)                    # (tq, N) f32

    m = jnp.max(scores, axis=-1, keepdims=True)
    e = jnp.exp(scores - m)
    denom = jnp.sum(e, axis=-1, keepdims=True)
    inv = pl.reciprocal(denom, approx=True)                    # EUP slot (~free)
    p = e * inv                                                # softmax weights

    w_ref[0] = p
    o_ref[0] = jnp.dot(p.astype(v.dtype), v,
                       preferred_element_type=jnp.float32)


def attention(q_bh, k_bh, v_bh, head_dim, *, tq=128):
    """q/k/v: (BH, N, D) f32 -> (attn_out (BH,N,D) f32, attn_weights (BH,N,N) f32)."""
    BH, N, D = q_bh.shape
    scale = 1.0 / (head_dim ** 0.5)

    # Fold the 1/sqrt(D) scale into Q (N*D mults once, not N*N per head).
    qs = (q_bh * scale).astype(jnp.bfloat16)
    kb = k_bh.astype(jnp.bfloat16)
    vb = v_bh.astype(jnp.bfloat16)

    tq = min(tq, N)
    if N % tq != 0:
        # TODO(synk): pad N for ragged query tiling; fall back to a full block.
        tq = N
    n_q = N // tq

    cost = pl.CostEstimate(
        flops=2 * 2 * BH * N * N * D,          # QK^T + PV
        transcendentals=BH * N * N,            # exp
        bytes_accessed=2 * 3 * BH * N * D + 4 * BH * N * (N + D))

    out, w = pl.pallas_call(
        _attention_kernel,
        out_shape=(jax.ShapeDtypeStruct((BH, N, D), jnp.float32),
                   jax.ShapeDtypeStruct((BH, N, N), jnp.float32)),
        grid_spec=pltpu.PrefetchScalarGridSpec(
            num_scalar_prefetch=0,
            grid=(BH, n_q),
            in_specs=[
                pl.BlockSpec((1, tq, D), lambda h, i: (h, i, 0)),
                pl.BlockSpec((1, N, D), lambda h, i: (h, 0, 0)),   # resident over q-tiles
                pl.BlockSpec((1, N, D), lambda h, i: (h, 0, 0)),
            ],
            out_specs=[
                pl.BlockSpec((1, tq, D), lambda h, i: (h, i, 0)),
                pl.BlockSpec((1, tq, N), lambda h, i: (h, i, 0)),
            ],
        ),
        compiler_params=pltpu.CompilerParams(
            dimension_semantics=("parallel", "parallel"),
            vmem_limit_bytes=_VMEM_LIMIT),
        cost_estimate=cost,
    )(qs, kb, vb)
    return out, w


# ------------------------------------------------------------------ #
# GroupedQueryAttention forward (inference)
# ------------------------------------------------------------------ #
class GroupedQueryAttentionPallas:
    def __init__(self, embed_size, num_heads, num_groups, key):
        assert embed_size % num_heads == 0
        assert num_heads % num_groups == 0
        self.embed_size = embed_size
        self.num_heads = num_heads
        self.num_groups = num_groups
        self.head_dim = embed_size // num_heads

        ks = jax.random.split(key, 8)
        init = lambda k, shape: (0.1 * jax.random.normal(k, shape)).astype(jnp.float32)
        E = embed_size
        # PyTorch nn.Linear weight layout: (out_features, in_features)
        self.wq, self.bq = init(ks[0], (E, E)), init(ks[1], (E,))
        self.wk, self.bk = init(ks[2], (E, E)), init(ks[3], (E,))
        self.wv, self.bv = init(ks[4], (E, E)), init(ks[5], (E,))
        self.wo, self.bo = init(ks[6], (E, E)), init(ks[7], (E,))
        # Fused QKV weight for the self-attention (q is k is v) fast path.
        self.w_qkv = jnp.concatenate([self.wq, self.wk, self.wv], axis=0)   # (3E, E)
        self.b_qkv = jnp.concatenate([self.bq, self.bk, self.bv], axis=0)   # (3E,)

    def __call__(self, q, k, v, mask=None):
        # TODO(synk): optional `mask` path not implemented (mask=None case only).
        B, N, E = q.shape
        H, D = self.num_heads, self.head_dim

        if (q is k) and (k is v):
            # Self-attention: one fused projection, activation read from HBM once.
            qkv = linear(q.reshape(B * N, E), self.w_qkv, self.b_qkv)
            qp, kp, vp = qkv[:, :E], qkv[:, E:2 * E], qkv[:, 2 * E:]
        else:
            qp = linear(q.reshape(B * N, E), self.wq, self.bq)
            kp = linear(k.reshape(B * N, E), self.wk, self.bk)
            vp = linear(v.reshape(B * N, E), self.wv, self.bv)

        # (B*N, E) -> (B, N, H, D) -> (B, H, N, D) -> (B*H, N, D)
        # TODO(synk): for head_dim that is a multiple of 128 this transpose could be
        # folded into the attention BlockSpec index_map (lane-alignment permitting).
        def to_heads(x):
            return (x.reshape(B, N, H, D)
                     .transpose(0, 2, 1, 3)
                     .reshape(B * H, N, D))

        attn_out, attn_w = attention(to_heads(qp), to_heads(kp), to_heads(vp), D)

        # (B*H, N, D) -> (B, H, N, D) -> (B, N, H, D) -> (B, N, E)
        attn_out = (attn_out.reshape(B, H, N, D)
                            .transpose(0, 2, 1, 3)
                            .reshape(B, N, E))

        out = linear(attn_out.reshape(B * N, E), self.wo, self.bo).reshape(B, N, E)
        attn_w = attn_w.reshape(B, H, N, N)  # same as torch.cat over groups (dim=1)
        return out, attn_w


# ------------------------------------------------------------------ #
# Pure-JAX (f32) reference for a sanity check
# ------------------------------------------------------------------ #
def reference_forward(mod, q, k, v):
    B, N, E = q.shape
    H, D = mod.num_heads, mod.head_dim
    lin = lambda x, w, b: x @ w.T + b
    qp = lin(q, mod.wq, mod.bq).reshape(B, N, H, D).transpose(0, 2, 1, 3)
    kp = lin(k, mod.wk, mod.bk).reshape(B, N, H, D).transpose(0, 2, 1, 3)
    vp = lin(v, mod.wv, mod.bv).reshape(B, N, H, D).transpose(0, 2, 1, 3)
    scores = jnp.einsum("bhqd,bhkd->bhqk", qp, kp) / (D ** 0.5)
    w = jax.nn.softmax(scores, axis=-1)
    attn = jnp.einsum("bhqk,bhkd->bhqd", w, vp)
    attn = attn.transpose(0, 2, 1, 3).reshape(B, N, E)
    out = lin(attn, mod.wo, mod.bo)
    return out, w


if __name__ == "__main__":
    B, N, E = 2, 8, 32
    num_heads, num_groups = 4, 2

    key = jax.random.PRNGKey(0)
    kparam, kq, kk, kv = jax.random.split(key, 4)

    mod = GroupedQueryAttentionPallas(E, num_heads, num_groups, kparam)

    q = jax.random.normal(kq, (B, N, E), dtype=jnp.float32)
    k = jax.random.normal(kk, (B, N, E), dtype=jnp.float32)
    v = jax.random.normal(kv, (B, N, E), dtype=jnp.float32)

    # Cross-attention path (distinct q/k/v -> three projection kernels).
    out, attn_w = mod(q, k, v)
    out = jax.block_until_ready(out)
    attn_w = jax.block_until_ready(attn_w)

    ref_out, ref_w = reference_forward(mod, q, k, v)
    assert out.shape == (B, N, E)
    assert attn_w.shape == (B, num_heads, N, N)
    # bf16 MXU inputs + approx reciprocal -> looser tolerance than pure f32.
    assert jnp.allclose(out, ref_out, atol=3e-2, rtol=3e-2)
    assert jnp.allclose(attn_w, ref_w, atol=3e-2, rtol=3e-2)

    # Self-attention path (fused (3E, E) QKV projection).
    out_sa, attn_w_sa = mod(q, q, q)
    out_sa = jax.block_until_ready(out_sa)
    ref_out_sa, ref_w_sa = reference_forward(mod, q, q, q)
    assert jnp.allclose(out_sa, ref_out_sa, atol=3e-2, rtol=3e-2)
    assert jnp.allclose(attn_w_sa, ref_w_sa, atol=3e-2, rtol=3e-2)

    print("KERNEL_OK")
</pallas_src>

<mosaic_0001>
module attributes {stable_mosaic.version = 11 : i64} {
  func.func @_linear_kernel(%arg0: i32, %arg1: i32, %arg2: i32, %arg3: memref<16x128xbf16, #tpu.memory_space<vmem>>, %arg4: memref<128x128xbf16, #tpu.memory_space<vmem>>, %arg5: memref<1x128xf32, #tpu.memory_space<vmem>>, %arg6: memref<16x128xf32, #tpu.memory_space<vmem>>, %arg7: memref<16x128xf32, #tpu.memory_space<vmem>>) attributes {dimension_semantics = [#tpu.dimension_semantics<parallel>, #tpu.dimension_semantics<parallel>, #tpu.dimension_semantics<arbitrary>], iteration_bounds = array<i64: 1, 1, 1>, scalar_prefetch = 0 : i64, scratch_operands = 1 : i64, tpu.core_type = #tpu.core_type<tc>, window_params = [{transform_indices = @transform_0, window_bounds = array<i64: 16, 128>}, {transform_indices = @transform_1, window_bounds = array<i64: 128, 128>}, {transform_indices = @transform_2, window_bounds = array<i64: 1, 128>}, {transform_indices = @transform_3, window_bounds = array<i64: 16, 128>}]} {
    %c0_i32 = arith.constant 0 : i32
    %0 = arith.cmpi eq, %arg2, %c0_i32 : i32
    %1 = arith.extui %0 : i1 to i32
    %c0_i32_0 = arith.constant 0 : i32
    %2 = arith.cmpi ne, %1, %c0_i32_0 : i32
    scf.if %2 {
      %cst_10 = arith.constant 0.000000e+00 : f32
      %12 = vector.broadcast %cst_10 : f32 to vector<16x128xf32>
      %c0_11 = arith.constant 0 : index
      %c0_12 = arith.constant 0 : index
      %13 = vector.load %arg7[%c0_11, %c0_12] : memref<16x128xf32, #tpu.memory_space<vmem>>, vector<16x128xf32>
      tpu.vector_store %arg7[%c0_11, %c0_12], %12 {strides = array<i32>} : memref<16x128xf32, #tpu.memory_space<vmem>>, vector<16x128xf32>,
    } else {
    }
    %c0 = arith.constant 0 : index
    %c0_1 = arith.constant 0 : index
    %3 = vector.load %arg7[%c0, %c0_1] : memref<16x128xf32, #tpu.memory_space<vmem>>, vector<16x128xf32>
    %c0_2 = arith.constant 0 : index
    %c0_3 = arith.constant 0 : index
    %4 = vector.load %arg3[%c0_2, %c0_3] : memref<16x128xbf16, #tpu.memory_space<vmem>>, vector<16x128xbf16>
    %c0_4 = arith.constant 0 : index
    %c0_5 = arith.constant 0 : index
    %5 = vector.load %arg4[%c0_4, %c0_5] : memref<128x128xbf16, #tpu.memory_space<vmem>>, vector<128x128xbf16>
    %cst = arith.constant dense<0.000000e+00> : vector<16x128xf32>
    %6 = tpu.matmul %4, %5, %cst {dimension_numbers = #tpu.dot_dimension_numbers<[1], [1], [0], [0], [0, 0, 1, 0], [], []>} : vector<16x128xbf16>, vector<128x128xbf16>, vector<16x128xf32> -> vector<16x128xf32>
    %7 = arith.addf %3, %6 : vector<16x128xf32>
    %c0_6 = arith.constant 0 : index
    %c0_7 = arith.constant 0 : index
    %8 = vector.load %arg7[%c0_6, %c0_7] : memref<16x128xf32, #tpu.memory_space<vmem>>, vector<16x128xf32>
    tpu.vector_store %arg7[%c0_6, %c0_7], %7 {strides = array<i32>} : memref<16x128xf32, #tpu.memory_space<vmem>>, vector<16x128xf32>,
    %c0_i32_8 = arith.constant 0 : i32
    %9 = arith.cmpi eq, %arg2, %c0_i32_8 : i32
    %10 = arith.extui %9 : i1 to i32
    %c0_i32_9 = arith.constant 0 : i32
    %11 = arith.cmpi ne, %10, %c0_i32_9 : i32
    scf.if %11 {
      %c0_10 = arith.constant 0 : index
      %c0_11 = arith.constant 0 : index
      %12 = vector.load %arg7[%c0_10, %c0_11] : memref<16x128xf32, #tpu.memory_space<vmem>>, vector<16x128xf32>
      %c0_12 = arith.constant 0 : index
      %c0_13 = arith.constant 0 : index
      %13 = vector.load %arg5[%c0_12, %c0_13] : memref<1x128xf32, #tpu.memory_space<vmem>>, vector<1x128xf32>
      %14 = vector.broadcast %13 : vector<1x128xf32> to vector<16x128xf32>
      %15 = arith.addf %12, %14 : vector<16x128xf32>
      %c0_14 = arith.constant 0 : index
      %c0_15 = arith.constant 0 : index
      %16 = vector.load %arg6[%c0_14, %c0_15] : memref<16x128xf32, #tpu.memory_space<vmem>>, vector<16x128xf32>
      tpu.vector_store %arg6[%c0_14, %c0_15], %15 {strides = array<i32>} : memref<16x128xf32, #tpu.memory_space<vmem>>, vector<16x128xf32>,
    } else {
    }
    return
  }
  func.func @transform_0(%arg0: i32, %arg1: i32, %arg2: i32) -> (i32, i32) {
    %c0_i32 = arith.constant 0 : i32
    return %arg0, %arg2 : i32, i32
  }
  func.func @transform_1(%arg0: i32, %arg1: i32, %arg2: i32) -> (i32, i32) {
    %c0_i32 = arith.constant 0 : i32
    return %arg1, %arg2 : i32, i32
  }
  func.func @transform_2(%arg0: i32, %arg1: i32, %arg2: i32) -> (i32, i32) {
    %c0_i32 = arith.constant 0 : i32
    %c0_i32_0 = arith.constant 0 : i32
    return %c0_i32, %arg1 : i32, i32
  }
  func.func @transform_3(%arg0: i32, %arg1: i32, %arg2: i32) -> (i32, i32) {
    %c0_i32 = arith.constant 0 : i32
    return %arg0, %arg1 : i32, i32
  }
}

</mosaic_0001>

<bundles_post_ra>
// kernel: tpu_custom_call.1
= control target key start
LH: loop header
LB: loop body
LE: loop exit
PB: predicated region body
PF: predicated region fallthrough
CT: control target
= control target key end

     0   :  { %8 = vsyncpa [#allocation4], 0  ;;  %s400_s0 = inlined_call_operand.hbm [shape: bf16[16,128], index: 0, kind: input, shape index: {}]   ;;  %s401_s1 = inlined_call_operand.hbm [shape: bf16[128,128], index: 1, kind: input, shape index: {}]   ;;  %s402_s2 = inlined_call_operand.vmem [shape: f32[1,128], index: 2, kind: input, shape index: {}]   ;;  %s403_s3 = inlined_call_operand.hbm [shape: f32[16,128], index: 3, kind: output, shape index: {}]  }
   0x1   :  { %9 = vsyncpa [#allocation7], 0 }
   0x2   :  { %10 = vsyncpa [#allocation5], 0  ;;  %s332_s12 = smov [#allocation3]   ;;  %s260_s16 = scalar_lea.hbm %s400_s0, 128 }
   0x3   :  { %s16_s13 = sshll.u32 %s332_s12, 4  ;;  %p261_p0 = scmp.ne.s32.totalorder %s400_s0, %s260_s16  ;;  %s17_s13 = int_to_ptr.vmem [resolvable:$true] %s16_s13 }
   0x4   :  { %p264_p1 = scmp.lt.u32.totalorder %s260_s16, %s400_s0 }
   0x6   :  { %p266_p2 = pnand %p264_p1, %p261_p0 }
   0x8   :  { %269 = shalt.err (!%p266_p2)
}
   0x9   :  { %s270_s21 = scalar_lea.vmem %s17_s13, 128  ;;  %p275_p4 = scmp.lt.s32.totalorder %s17_s13, %s17_s13 }
   0xa   :  { %p271_p3 = scmp.ne.s32.totalorder %s17_s13, %s270_s21  ;;  %p276_p5 = scmp.lt.s32.totalorder %s270_s21, %s270_s21 }
   0xc   :  { %p277_p6 = por %p276_p5, %p275_p4 }
   0xe   :  { %p278_p7 = pnand %p277_p6, %p271_p3 }
  0x10   :  { %281 = shalt.err (!%p278_p7)
}
  0x11   :  { %s333_s22 = smov 64   ;;  %s334_s23 = smov 4  }
  0x12   :  { %22 = dma.hbm_to_vmem [thread:$0]  %s400_s0, 128, %s17_s13, [#allocation4], %s333_s22, %s333_s22, %s334_s23  }
  0x13   :  { %s335_s26 = smov [#allocation6]   ;;  %s282_s30 = scalar_lea.hbm %s401_s1, 1024 }
  0x14   :  { %s28_s27 = sshll.u32 %s335_s26, 4  ;;  %p283_p8 = scmp.ne.s32.totalorder %s401_s1, %s282_s30  ;;  %s29_s27 = int_to_ptr.vmem [resolvable:$true] %s28_s27 }
  0x15   :  { %p286_p9 = scmp.lt.u32.totalorder %s282_s30, %s401_s1 }
  0x17   :  { %p288_p10 = pnand %p286_p9, %p283_p8 }
  0x19   :  { %291 = shalt.err (!%p288_p10)
}
  0x1a   :  { %s292_s8 = scalar_lea.vmem %s29_s27, 1024  ;;  %p297_p12 = scmp.lt.s32.totalorder %s29_s27, %s29_s27 }
  0x1b   :  { %p293_p11 = scmp.ne.s32.totalorder %s29_s27, %s292_s8  ;;  %p298_p13 = scmp.lt.s32.totalorder %s292_s8, %s292_s8 }
  0x1d   :  { %p299_p0 = por %p298_p13, %p297_p12 }
  0x1f   :  { %p300_p1 = pnand %p299_p0, %p293_p11 }
  0x21   :  { %303 = shalt.err (!%p300_p1)
}
  0x22   :  { %34 = dma.hbm_to_vmem [thread:$0]  %s401_s1, 1024, %s29_s27, [#allocation7], %s333_s22, %s333_s22, %s334_s23  }
  0x23   :  { %326 = dma.done.wait [#allocation4], 128  }
  0x24   :  { %327 = vsyncadd [#allocation4], 4294967168 }
  0x25   :  { %328 = dma.done.wait [#allocation7], 1024  }
  0x26   :  { %329 = vsyncadd [#allocation7], 4294966272  ;;  %v336_v0 = vmov 0.0   ;;  %vm337_vm0 = vmmov 0   ;;  %v251_v1 = vld [vmem:[#allocation6] sm:$0xff]   ;;  %v252_v2 = vld [vmem:[#allocation6 + $0x8] sm:$0xff]  }
  0x27   :  { %222 = vmatprep.subr.bf16.mxu0 %v336_v0  ;;  %238 = vmatprep.mubr.msk.bf16.mxu0 %vm337_vm0, %v336_v0  ;;  %v253_v3 = vld [vmem:[#allocation6 + $0x10] sm:$0xff]   ;;  %v254_v4 = vld [vmem:[#allocation6 + $0x18] sm:$0xff]   ;;  %v255_v5 = vld [vmem:[#allocation6 + $0x20] sm:$0xff]   ;;  %s338_s11 = smov [#allocation8]  }
  0x28   :  { %223 = vmatpush3.bf16.xpose.msra.mxu0 %v251_v1  ;;  %v256_v6 = vld [vmem:[#allocation6 + $0x28] sm:$0xff]   ;;  %v257_v7 = vld [vmem:[#allocation6 + $0x30] sm:$0xff]   ;;  %v258_v8 = vld [vmem:[#allocation6 + $0x38] sm:$0xff]   ;;  %s190_s12 = sshll.u32 %s338_s11, 4  ;;  %s191_s12 = int_to_ptr.vmem [resolvable:$true] %s190_s12 }
  0x29   :  { %224 = vmatprep.subr.bf16.mxu0 %v336_v0  ;;  %v259_v9 = vld [vmem:[#allocation3] sm:$0xff]   ;;  %s304_s13 = scalar_lea.vmem %s191_s12, 256  ;;  %p309_p3 = scmp.lt.s32.totalorder %s191_s12, %s191_s12 }
  0x2a   :  { %v212_v10 = vld [vmem:[%s402_s2] ss:$0 sm:$0xff]  ;;  %p305_p2 = scmp.ne.s32.totalorder %s191_s12, %s304_s13  ;;  %p310_p4 = scmp.lt.s32.totalorder %s304_s13, %s304_s13 }
  0x2c   :  { %p311_p5 = por %p310_p4, %p309_p3 }
  0x2e   :  { %p312_p6 = pnand %p311_p5, %p305_p2 }
  0x30   :  { %225 = vmatpush3.bf16.xpose.msra.mxu0 %v252_v2 }
  0x31   :  { %226 = vmatprep.subr.bf16.mxu0 %v336_v0 }
  0x38   :  { %227 = vmatpush3.bf16.xpose.msra.mxu0 %v253_v3 }
  0x39   :  { %228 = vmatprep.subr.bf16.mxu0 %v336_v0 }
  0x40   :  { %229 = vmatpush3.bf16.xpose.msra.mxu0 %v254_v4 }
  0x41   :  { %230 = vmatprep.subr.bf16.mxu0 %v336_v0 }
  0x48   :  { %231 = vmatpush3.bf16.xpose.msra.mxu0 %v255_v5 }
  0x49   :  { %232 = vmatprep.subr.bf16.mxu0 %v336_v0 }
  0x50   :  { %233 = vmatpush3.bf16.xpose.msra.mxu0 %v256_v6 }
  0x51   :  { %234 = vmatprep.subr.bf16.mxu0 %v336_v0 }
  0x58   :  { %235 = vmatpush3.bf16.xpose.msra.mxu0 %v257_v7 }
  0x59   :  { %236 = vmatprep.subr.bf16.mxu0 %v336_v0 }
  0x60   :  { %237 = vmatpush3.bf16.xpose.msra.mxu0 %v258_v8 }
  0x67   :  { %239 = vmatmul.mubr.bf16.vlgmr.msra.gmra.mrb[0].mxu0 %v259_v9 }
 0x13a   :  { %v158_v11 = vpop.f32.mrb[0].mxu0 }
 0x13b   :  { %v181_v12 = vadd.f32 %v212_v10, %v158_v11  ;;  %v240_v13 = vpop.f32.mrb[1].mxu0 }
 0x13c   :  { %v161_v14 = vpop.f32.mrb[2].mxu0 }
 0x13d   :  { %183 = vst [vmem:[#allocation8] sm:$0xff] %v181_v12  ;;  %v182_v15 = vadd.f32 %v212_v10, %v161_v14  ;;  %v241_v16 = vpop.f32.mrb[3].mxu0 }
 0x13f   :  { %184 = vst [vmem:[#allocation8 + $0x8] sm:$0xff] %v182_v15 }
 0x140   :  { %315 = shalt.err (!%p312_p6)
}
 0x141   :  { %s316_s15 = scalar_lea.hbm %s403_s3, 256 }
 0x142   :  { %p317_p7 = scmp.ne.s32.totalorder %s403_s3, %s316_s15  ;;  %p320_p8 = scmp.lt.u32.totalorder %s316_s15, %s403_s3 }
 0x144   :  { %p322_p9 = pnand %p320_p8, %p317_p7 }
 0x146   :  { %325 = shalt.err (!%p322_p9)
}
 0x147   :  { %s339_s20 = smov 128   ;;  %s340_s21 = smov 8  }
 0x148   :  { %196 = dma.vmem_to_hbm [thread:$0]  %s191_s12, 256, %s403_s3, [#allocation5], %s339_s20, %s339_s20, %s340_s21  }
 0x149   :  { %330 = dma.done.wait [#allocation5], 256  }
 0x14a   :  { %331 = vsyncadd [#allocation5], 4294967040 }
 0x14b   :  { %200 = vsyncpa [#allocation4], 1 }
 0x14c   :  { %201 = vsyncpa [#allocation7], 1 }
 0x14d   :  { %202 = vsyncpa [#allocation5], 1 }

</bundles_post_ra>
